<compile_context>
chip_gen: v7x
topology: tpu7x:2x2x1
jax: 0.10.0
libtpu: 0.0.40
codegen_flags: <defaults>
</compile_context>

<pallas_src>
import functools

import jax
import jax.numpy as jnp
from jax import lax
from jax.experimental import pallas as pl
from jax.experimental.pallas import tpu as pltpu

HIDDEN = 512
LANE = 128
SUBLANE = 8


def _round_up(n, m):
    return (n + m - 1) // m * m


def _supports_bf16_elementwise():
    """bf16 VPU/EUP exists on v6e/v7x; keep elementwise math in f32 on v5 and older."""
    try:
        kind = jax.devices()[0].device_kind.lower()
    except Exception:
        return True
    return not any(tag in kind for tag in ("v2", "v3", "v4", "v5"))


_USE_BF16_ELEMENTWISE = _supports_bf16_elementwise()


def _choose_tile(batch):
    """Batch tile: sublane-aligned, <= 1024 rows, >= 2 tiles for large batches (v7x 2 TCs)."""
    if batch <= 64:
        return _round_up(max(batch, SUBLANE), SUBLANE)
    n_tiles = max(2, -(-batch // 1024))            # cdiv; at least two grid steps
    return _round_up(-(-batch // n_tiles), SUBLANE)


def _make_policy_kernel(action_size, use_bf16_elementwise):
    """Kernel closure over the (static) number of actions and elementwise dtype."""

    def kernel(x_ref, w1_ref, b1_ref, w23_ref, b23_ref, out_ref):
        # fc1: bf16 operands on the MXU, f32 accumulation, f32 bias add.
        h = jnp.dot(x_ref[...], w1_ref[...], preferred_element_type=jnp.float32)
        h = h + b1_ref[...]                                       # (tb, H)

        # ELU(alpha=1); exp argument clamped to <= 0 so large positive h never
        # hits exp.  bf16 on v6e/v7x (EUP is the saturating slot), f32 on v5e.
        if use_bf16_elementwise:
            hb = h.astype(jnp.bfloat16)
            zero = jnp.bfloat16(0.0)
            h_act = jnp.where(hb > zero,
                              hb,
                              jnp.exp(jnp.minimum(hb, zero)) - jnp.bfloat16(1.0))
        else:
            h_f32 = jnp.where(h > 0.0, h, jnp.exp(jnp.minimum(h, 0.0)) - 1.0)
            h_act = h_f32.astype(jnp.bfloat16)

        # Fused actor+critic head: single lane-dense (tb, 128) matmul.
        z = jnp.dot(h_act, w23_ref[...], preferred_element_type=jnp.float32)
        z = z + b23_ref[...]                                      # (tb, OUT)

        col = lax.broadcasted_iota(jnp.int32, z.shape, 1)
        act_mask = col < action_size

        # Masked softmax over the first `action_size` lanes only (f32).
        logits = jnp.where(act_mask, z, jnp.float32(-1e30))
        m = jnp.max(logits, axis=-1, keepdims=True)
        e = jnp.exp(logits - m)
        s = jnp.sum(e, axis=-1, keepdims=True)
        # Exact reciprocal (approx=False); it is only a (tb, 1) column.
        probs = e * pl.reciprocal(s, approx=False)
        probs = jnp.where(act_mask, probs, 0.0)                   # explicit re-mask

        # Pack: lanes [0, A) = action probs, lane A = state value, rest = 0.
        out = probs + jnp.where(col == action_size, z, 0.0)
        out_ref[...] = out.astype(out_ref.dtype)

    return kernel


@functools.partial(jax.jit, static_argnums=(2,))
def policy_forward(x, packed_params, action_size):
    """x: (B, *input_shape). Returns (action_probs (B, A), state_value (B, 1))."""
    w1p, b1p, w23p, b23 = packed_params
    B = x.shape[0]
    # nn.Flatten + bf16 cast fused into one wrapper pass; no feature padding.
    x_flat = x.reshape(B, -1).astype(jnp.bfloat16)
    D = x_flat.shape[1]
    H = w1p.shape[1]
    OUT = w23p.shape[1]

    tb = _choose_tile(B)
    grid_len = pl.cdiv(B, tb)
    Bp = grid_len * tb
    if Bp != B:
        x_flat = jnp.pad(x_flat, ((0, Bp - B), (0, 0)))

    out = pl.pallas_call(
        _make_policy_kernel(action_size, _USE_BF16_ELEMENTWISE),
        out_shape=jax.ShapeDtypeStruct((Bp, OUT), jnp.float32),
        grid=(grid_len,),
        in_specs=[
            pl.BlockSpec((tb, D), lambda i: (i, 0)),     # activations: tiled over batch, bf16
            pl.BlockSpec((D, H), lambda i: (0, 0)),      # fc1 weights, VMEM-resident
            pl.BlockSpec((1, H), lambda i: (0, 0)),      # fc1 bias (f32), VMEM-resident
            pl.BlockSpec((H, OUT), lambda i: (0, 0)),    # fused actor+critic weights
            pl.BlockSpec((1, OUT), lambda i: (0, 0)),    # fused head biases
        ],
        out_specs=pl.BlockSpec((tb, OUT), lambda i: (i, 0)),
        compiler_params=pltpu.CompilerParams(
            dimension_semantics=("parallel",)),
    )(x_flat, w1p, b1p, w23p, b23)

    # Slices live inside the same jit -> fused with the output copy by XLA.
    action_probs = out[:B, :action_size]
    state_value = out[:B, action_size:action_size + 1]
    return action_probs, state_value


def pack_params(params):
    """Pack PyTorch-layout params (stored as (in, out)) into the fused kernel layout."""
    w1, b1, w2, b2, w3, b3 = params
    D, H = w1.shape
    A = w2.shape[1]
    OUT = _round_up(A + 1, LANE)           # actions + value lane, lane-padded to 128

    w1p = w1.astype(jnp.bfloat16)                       # (D, H)
    b1p = b1.reshape(1, H).astype(jnp.float32)          # (1, H) separate f32 bias

    w23 = jnp.zeros((H, OUT), jnp.float32)
    w23 = w23.at[:, :A].set(w2)
    w23 = w23.at[:, A].set(w3[:, 0])
    w23p = w23.astype(jnp.bfloat16)

    b23 = jnp.zeros((1, OUT), jnp.float32)
    b23 = b23.at[0, :A].set(b2)
    b23 = b23.at[0, A].set(b3[0])
    return (w1p, b1p, w23p, b23)


def init_params(key, input_shape, action_size, hidden=HIDDEN):
    """Deterministic init matching nn.Linear shapes (stored transposed as (in, out))."""
    D = 1
    for s in input_shape:
        D *= s
    k1, k2, k3, k4, k5, k6 = jax.random.split(key, 6)

    def uinit(k, shape, fan_in):
        bound = 1.0 / jnp.sqrt(fan_in)
        return jax.random.uniform(k, shape, jnp.float32, -bound, bound)

    w1 = uinit(k1, (D, hidden), D)
    b1 = uinit(k2, (hidden,), D)
    w2 = uinit(k3, (hidden, action_size), hidden)
    b2 = uinit(k4, (action_size,), hidden)
    w3 = uinit(k5, (hidden, 1), hidden)
    b3 = uinit(k6, (1,), hidden)
    return (w1, b1, w2, b2, w3, b3)


def policy_reference(x, params):
    """Pure-JAX f32 reference matching the PyTorch module."""
    w1, b1, w2, b2, w3, b3 = params
    B = x.shape[0]
    xf = x.reshape(B, -1)
    h = xf @ w1 + b1
    h = jnp.where(h > 0, h, jnp.expm1(h))
    probs = jax.nn.softmax(h @ w2 + b2, axis=-1)
    value = h @ w3 + b3
    return probs, value


if __name__ == "__main__":
    key = jax.random.PRNGKey(0)
    kx, kp = jax.random.split(key)

    input_shape = (4, 8)     # prod = 32
    action_size = 4
    batch = 2

    x = jax.random.normal(kx, (batch,) + input_shape, dtype=jnp.float32)
    params = init_params(kp, input_shape, action_size)
    packed = pack_params(params)

    probs, value = policy_forward(x, packed, action_size)
    jax.block_until_ready((probs, value))

    assert probs.shape == (batch, action_size)
    assert value.shape == (batch, 1)
    # softmax rows sum to 1 (exact reciprocal -> tight tolerance holds)
    assert bool(jnp.all(jnp.abs(jnp.sum(probs, axis=-1) - 1.0) < 1e-5))

    # agreement with f32 reference (bf16 matmul operands / activations -> loose tolerance)
    ref_p, ref_v = policy_reference(x, params)
    assert bool(jnp.all(jnp.abs(probs - ref_p) < 3e-2))
    assert bool(jnp.all(jnp.abs(value - ref_v) < 3e-2))

    print("KERNEL_OK")
</pallas_src>

<mosaic_0001>
module attributes {stable_mosaic.version = 11 : i64} {
  func.func @kernel(%arg0: i32, %arg1: memref<8x32xbf16, #tpu.memory_space<vmem>>, %arg2: memref<32x512xbf16, #tpu.memory_space<vmem>>, %arg3: memref<1x512xf32, #tpu.memory_space<vmem>>, %arg4: memref<512x128xbf16, #tpu.memory_space<vmem>>, %arg5: memref<1x128xf32, #tpu.memory_space<vmem>>, %arg6: memref<8x128xf32, #tpu.memory_space<vmem>>) attributes {dimension_semantics = [#tpu.dimension_semantics<parallel>], iteration_bounds = array<i64: 1>, scalar_prefetch = 0 : i64, scratch_operands = 0 : i64, tpu.core_type = #tpu.core_type<tc>, window_params = [{transform_indices = @transform_0, window_bounds = array<i64: 8, 32>}, {pipeline_mode = #tpu.pipeline_mode<synchronous>, transform_indices = @transform_1, window_bounds = array<i64: 32, 512>}, {pipeline_mode = #tpu.pipeline_mode<synchronous>, transform_indices = @transform_2, window_bounds = array<i64: 1, 512>}, {pipeline_mode = #tpu.pipeline_mode<synchronous>, transform_indices = @transform_3, window_bounds = array<i64: 512, 128>}, {pipeline_mode = #tpu.pipeline_mode<synchronous>, transform_indices = @transform_4, window_bounds = array<i64: 1, 128>}, {transform_indices = @transform_5, window_bounds = array<i64: 8, 128>}]} {
    %c0 = arith.constant 0 : index
    %c0_0 = arith.constant 0 : index
    %0 = vector.load %arg1[%c0, %c0_0] : memref<8x32xbf16, #tpu.memory_space<vmem>>, vector<8x32xbf16>
    %c0_1 = arith.constant 0 : index
    %c0_2 = arith.constant 0 : index
    %1 = vector.load %arg2[%c0_1, %c0_2] : memref<32x512xbf16, #tpu.memory_space<vmem>>, vector<32x512xbf16>
    %cst = arith.constant dense<0.000000e+00> : vector<8x512xf32>
    %2 = tpu.matmul %0, %1, %cst {dimension_numbers = #tpu.dot_dimension_numbers<[1], [0], [0], [1], [0, 0, 1, 1], [], []>} : vector<8x32xbf16>, vector<32x512xbf16>, vector<8x512xf32> -> vector<8x512xf32>
    %c0_3 = arith.constant 0 : index
    %c0_4 = arith.constant 0 : index
    %3 = vector.load %arg3[%c0_3, %c0_4] : memref<1x512xf32, #tpu.memory_space<vmem>>, vector<1x512xf32>
    %4 = vector.broadcast %3 : vector<1x512xf32> to vector<8x512xf32>
    %5 = arith.addf %2, %4 : vector<8x512xf32>
    %6 = arith.truncf %5 : vector<8x512xf32> to vector<8x512xbf16>
    %cst_5 = arith.constant 0.000000e+00 : bf16
    %7 = vector.broadcast %cst_5 : bf16 to vector<8x512xbf16>
    %8 = arith.cmpf ogt, %6, %7 : vector<8x512xbf16>
    %cst_6 = arith.constant 0.000000e+00 : bf16
    %9 = vector.broadcast %cst_6 : bf16 to vector<8x512xbf16>
    %10 = arith.minimumf %6, %9 : vector<8x512xbf16>
    %11 = math.exp %10 : vector<8x512xbf16>
    %cst_7 = arith.constant 1.000000e+00 : bf16
    %12 = vector.broadcast %cst_7 : bf16 to vector<8x512xbf16>
    %13 = arith.subf %11, %12 : vector<8x512xbf16>
    %14 = arith.select %8, %6, %13 : vector<8x512xi1>, vector<8x512xbf16>
    %c0_8 = arith.constant 0 : index
    %c0_9 = arith.constant 0 : index
    %15 = vector.load %arg4[%c0_8, %c0_9] : memref<512x128xbf16, #tpu.memory_space<vmem>>, vector<512x128xbf16>
    %cst_10 = arith.constant dense<0.000000e+00> : vector<8x128xf32>
    %16 = tpu.matmul %14, %15, %cst_10 {dimension_numbers = #tpu.dot_dimension_numbers<[1], [0], [0], [1], [0, 0, 1, 1], [], []>} : vector<8x512xbf16>, vector<512x128xbf16>, vector<8x128xf32> -> vector<8x128xf32>
    %c0_11 = arith.constant 0 : index
    %c0_12 = arith.constant 0 : index
    %17 = vector.load %arg5[%c0_11, %c0_12] : memref<1x128xf32, #tpu.memory_space<vmem>>, vector<1x128xf32>
    %18 = vector.broadcast %17 : vector<1x128xf32> to vector<8x128xf32>
    %19 = arith.addf %16, %18 : vector<8x128xf32>
    %20 = tpu.iota {dimensions = array<i32: 1>} : vector<8x128xi32>
    %c4_i32 = arith.constant 4 : i32
    %21 = vector.broadcast %c4_i32 : i32 to vector<8x128xi32>
    %22 = arith.cmpi slt, %20, %21 : vector<8x128xi32>
    %cst_13 = arith.constant -1.000000e+30 : f32
    %23 = vector.broadcast %cst_13 : f32 to vector<8x128xf32>
    %24 = arith.select %22, %19, %23 : vector<8x128xi1>, vector<8x128xf32>
    %cst_14 = arith.constant dense<0xFF800000> : vector<8xf32>
    %25 = vector.multi_reduction <maximumf>, %24, %cst_14 [1] : vector<8x128xf32> to vector<8xf32>
    %26 = vector.shape_cast %25 : vector<8xf32> to vector<8x1xf32>
    %27 = vector.broadcast %26 : vector<8x1xf32> to vector<8x128xf32>
    %28 = arith.subf %24, %27 : vector<8x128xf32>
    %29 = math.exp %28 : vector<8x128xf32>
    %cst_15 = arith.constant dense<0.000000e+00> : vector<8xf32>
    %30 = vector.multi_reduction <add>, %29, %cst_15 [1] : vector<8x128xf32> to vector<8xf32>
    %31 = vector.shape_cast %30 : vector<8xf32> to vector<8x1xf32>
    %32 = tpu.reciprocal %31 : vector<8x1xf32> -> vector<8x1xf32>
    %33 = vector.broadcast %32 : vector<8x1xf32> to vector<8x128xf32>
    %34 = arith.mulf %29, %33 : vector<8x128xf32>
    %cst_16 = arith.constant 0.000000e+00 : f32
    %35 = vector.broadcast %cst_16 : f32 to vector<8x128xf32>
    %36 = arith.select %22, %34, %35 : vector<8x128xi1>, vector<8x128xf32>
    %c4_i32_17 = arith.constant 4 : i32
    %37 = vector.broadcast %c4_i32_17 : i32 to vector<8x128xi32>
    %38 = arith.cmpi eq, %20, %37 : vector<8x128xi32>
    %cst_18 = arith.constant 0.000000e+00 : f32
    %39 = vector.broadcast %cst_18 : f32 to vector<8x128xf32>
    %40 = arith.select %38, %19, %39 : vector<8x128xi1>, vector<8x128xf32>
    %41 = arith.addf %36, %40 : vector<8x128xf32>
    %c0_19 = arith.constant 0 : index
    %c0_20 = arith.constant 0 : index
    %42 = vector.load %arg6[%c0_19, %c0_20] : memref<8x128xf32, #tpu.memory_space<vmem>>, vector<8x128xf32>
    tpu.vector_store %arg6[%c0_19, %c0_20], %41 {strides = array<i32>} : memref<8x128xf32, #tpu.memory_space<vmem>>, vector<8x128xf32>,
    return
  }
  func.func @transform_0(%arg0: i32) -> (i32, i32) {
    %c0_i32 = arith.constant 0 : i32
    %c0_i32_0 = arith.constant 0 : i32
    return %arg0, %c0_i32 : i32, i32
  }
  func.func @transform_1(%arg0: i32) -> (i32, i32) {
    %c0_i32 = arith.constant 0 : i32
    %c0_i32_0 = arith.constant 0 : i32
    %c0_i32_1 = arith.constant 0 : i32
    return %c0_i32, %c0_i32_0 : i32, i32
  }
  func.func @transform_2(%arg0: i32) -> (i32, i32) {
    %c0_i32 = arith.constant 0 : i32
    %c0_i32_0 = arith.constant 0 : i32
    %c0_i32_1 = arith.constant 0 : i32
    return %c0_i32, %c0_i32_0 : i32, i32
  }
  func.func @transform_3(%arg0: i32) -> (i32, i32) {
    %c0_i32 = arith.constant 0 : i32
    %c0_i32_0 = arith.constant 0 : i32
    %c0_i32_1 = arith.constant 0 : i32
    return %c0_i32, %c0_i32_0 : i32, i32
  }
  func.func @transform_4(%arg0: i32) -> (i32, i32) {
    %c0_i32 = arith.constant 0 : i32
    %c0_i32_0 = arith.constant 0 : i32
    %c0_i32_1 = arith.constant 0 : i32
    return %c0_i32, %c0_i32_0 : i32, i32
  }
  func.func @transform_5(%arg0: i32) -> (i32, i32) {
    %c0_i32 = arith.constant 0 : i32
    %c0_i32_0 = arith.constant 0 : i32
    return %arg0, %c0_i32 : i32, i32
  }
}

</mosaic_0001>

<bundles_post_ra>
// kernel: policy_forward.1
= control target key start
LH: loop header
LB: loop body
LE: loop exit
PB: predicated region body
PF: predicated region fallthrough
CT: control target
= control target key end

     0   :  { %10 = vsyncpa [#allocation3], 0  ;;  %s889_s0 = inlined_call_operand.vmem [shape: bf16[8,32], index: 0, kind: input, shape index: {}]   ;;  %s890_s1 = inlined_call_operand.hbm [shape: bf16[32,512], index: 1, kind: input, shape index: {}]   ;;  %s891_s2 = inlined_call_operand.vmem [shape: f32[1,512], index: 2, kind: input, shape index: {}]   ;;  %s892_s3 = inlined_call_operand.hbm [shape: bf16[512,128], index: 3, kind: input, shape index: {}]   ;;  %s893_s4 = inlined_call_operand.vmem [shape: f32[1,128], index: 4, kind: input, shape index: {}]   ;;  %s894_s5 = inlined_call_operand.vmem [shape: f32[8,128], index: 5, kind: output, shape index: {}]  }
   0x1   :  { %11 = vsyncpa [#allocation5], 0  ;;  %s805_s18 = smov [#allocation2]   ;;  %s757_s22 = scalar_lea.hbm %s890_s1, 1024 }
   0x2   :  { %s19_s19 = sshll.u32 %s805_s18, 4  ;;  %p758_p0 = scmp.ne.s32.totalorder %s890_s1, %s757_s22  ;;  %s20_s19 = int_to_ptr.vmem [resolvable:$true] %s19_s19 }
   0x3   :  { %p761_p1 = scmp.lt.u32.totalorder %s757_s22, %s890_s1 }
   0x5   :  { %p763_p2 = pnand %p761_p1, %p758_p0 }
   0x7   :  { %766 = shalt.err (!%p763_p2)
}
   0x8   :  { %s767_s27 = scalar_lea.vmem %s20_s19, 1024  ;;  %p772_p4 = scmp.lt.s32.totalorder %s20_s19, %s20_s19 }
   0x9   :  { %p768_p3 = scmp.ne.s32.totalorder %s20_s19, %s767_s27  ;;  %p773_p5 = scmp.lt.s32.totalorder %s767_s27, %s767_s27 }
   0xb   :  { %p774_p6 = por %p773_p5, %p772_p4 }
   0xd   :  { %p775_p7 = pnand %p774_p6, %p768_p3 }
   0xf   :  { %778 = shalt.err (!%p775_p7)
}
  0x10   :  { %s806_s28 = smov 256   ;;  %s807_s29 = smov 16  }
  0x11   :  { %25 = dma.hbm_to_vmem [thread:$0]  %s890_s1, 1024, %s20_s19, [#allocation3], %s806_s28, %s806_s28, %s807_s29  }
  0x12   :  { %s808_s7 = smov [#allocation4]   ;;  %s779_s11 = scalar_lea.hbm %s892_s3, 4096 }
  0x13   :  { %s33_s8 = sshll.u32 %s808_s7, 4  ;;  %p780_p8 = scmp.ne.s32.totalorder %s892_s3, %s779_s11  ;;  %s34_s8 = int_to_ptr.vmem [resolvable:$true] %s33_s8 }
  0x14   :  { %p783_p9 = scmp.lt.u32.totalorder %s779_s11, %s892_s3 }
  0x16   :  { %p785_p10 = pnand %p783_p9, %p780_p8 }
  0x18   :  { %788 = shalt.err (!%p785_p10)
}
  0x19   :  { %s789_s16 = scalar_lea.vmem %s34_s8, 4096  ;;  %p794_p12 = scmp.lt.s32.totalorder %s34_s8, %s34_s8 }
  0x1a   :  { %p790_p11 = scmp.ne.s32.totalorder %s34_s8, %s789_s16  ;;  %p795_p13 = scmp.lt.s32.totalorder %s789_s16, %s789_s16 }
  0x1c   :  { %p796_p0 = por %p795_p13, %p794_p12 }
  0x1e   :  { %p797_p1 = pnand %p796_p0, %p790_p11 }
  0x20   :  { %800 = shalt.err (!%p797_p1)
}
  0x21   :  { %s809_s1 = smov 64   ;;  %s810_s17 = smov 4  }
  0x22   :  { %39 = dma.hbm_to_vmem [thread:$0]  %s892_s3, 4096, %s34_s8, [#allocation5], %s809_s1, %s809_s1, %s810_s17  }
  0x23   :  { %801 = dma.done.wait [#allocation3], 1024  }
  0x24   :  { %802 = vsyncadd [#allocation3], 4294966272 }
  0x25   :  { %803 = dma.done.wait [#allocation5], 4096  }
  0x26   :  { %804 = vsyncadd [#allocation5], 4294963200  ;;  %v811_v0 = vmov 0   ;;  %v701_v1 = vld [vmem:[#allocation2 + $0x4] ss:$16 sps:$4 sm:$0xff]   ;;  %vm121_vm0 = vcmask 261120   ;;  %v61_v42 = vlaneseq }
  0x27   :  { %157 = vmatprep.mubr.bf16.mxu0 %v811_v0  ;;  %198 = vmatprep.mubr.bf16.mxu1 %v811_v0  ;;  %v703_v2 = vld [vmem:[#allocation2 + $0xc] ss:$16 sps:$4 sm:$0xff]   ;;  %v705_v3 = vld [vmem:[#allocation2] ss:$16 sps:$4 sm:$0xff]   ;;  %v706_v4 = vld [vmem:[#allocation2 + $0x8] ss:$16 sps:$4 sm:$0xff]  }
  0x28   :  { %125 = vmatprep.subr.bf16.mxu0 %v701_v1  ;;  %166 = vmatprep.subr.bf16.mxu1 %v703_v2  ;;  %v707_v5 = vld [vmem:[#allocation2 + $0x24] ss:$16 sps:$4 sm:$0xff]   ;;  %v709_v6 = vld [vmem:[#allocation2 + $0x2c] ss:$16 sps:$4 sm:$0xff]   ;;  %v711_v7 = vld [vmem:[#allocation2 + $0x20] ss:$16 sps:$4 sm:$0xff]  }
  0x29   :  { %126 = vmatpush1.bf16.msra.mxu0 %v705_v3  ;;  %167 = vmatpush1.bf16.msra.mxu1 %v706_v4  ;;  %v712_v8 = vld [vmem:[#allocation2 + $0x28] ss:$16 sps:$4 sm:$0xff]   ;;  %v50_v9 = vld [vmem:[%s889_s0] sm:$0xf]  ;;  %v721_v18 = vld [vmem:[#allocation4 + $0x50] sm:$0xff]   ;;  %v62_v43 = vshrl.u32 %v61_v42, 7 }
  0x2a   :  { %127 = vmatprep.subr.bf16.mxu0 %v707_v5  ;;  %168 = vmatprep.subr.bf16.mxu1 %v709_v6  ;;  %v713_v10 = vld [vmem:[#allocation4 + $0x40] sm:$0xff]   ;;  %v717_v14 = vld [vmem:[#allocation4 + $0x48] sm:$0xff]   ;;  %v722_v19 = vld [vmem:[#allocation4 + $0xd0] sm:$0xff]  }
  0x2b   :  { %v714_v11 = vld [vmem:[#allocation4 + $0xc0] sm:$0xff]   ;;  %v718_v15 = vld [vmem:[#allocation4 + $0xc8] sm:$0xff]   ;;  %v723_v20 = vld [vmem:[#allocation4 + $0x10] sm:$0xff]   ;;  %v63_v44 = vsub.s32 0, %v62_v43  ;;  %v71_v45 = vsub.s32 2, %v62_v43  ;;  %v67_v47 = vsub.s32 1, %v62_v43 }
  0x2c   :  { %v715_v12 = vld [vmem:[#allocation4] sm:$0xff]   ;;  %v719_v16 = vld [vmem:[#allocation4 + $0x8] sm:$0xff]   ;;  %v724_v21 = vld [vmem:[#allocation4 + $0x90] sm:$0xff]   ;;  %v75_v48 = vsub.s32 3, %v62_v43 }
  0x2d   :  { %128 = vmatpush1.bf16.msra.mxu0 %v711_v7  ;;  %169 = vmatpush1.bf16.msra.mxu1 %v712_v8  ;;  %v716_v13 = vld [vmem:[#allocation4 + $0x80] sm:$0xff]   ;;  %v720_v17 = vld [vmem:[#allocation4 + $0x88] sm:$0xff]   ;;  %v725_v22 = vld [vmem:[#allocation4 + $0x58] sm:$0xff]  }
  0x2e   :  { %649 = vmatprep.subr.bf16.mxu0 %v713_v10  ;;  %671 = vmatprep.subr.bf16.mxu1 %v714_v11  ;;  %v726_v23 = vld [vmem:[#allocation4 + $0xd8] sm:$0xff]   ;;  %v729_v26 = vld [vmem:[#allocation4 + $0x60] sm:$0xff]   ;;  %v733_v30 = vld [vmem:[#allocation4 + $0x68] sm:$0xff]  }
  0x2f   :  { %v727_v24 = vld [vmem:[#allocation4 + $0x18] sm:$0xff]   ;;  %v730_v27 = vld [vmem:[#allocation4 + $0xe0] sm:$0xff]   ;;  %v734_v31 = vld [vmem:[#allocation4 + $0xe8] sm:$0xff]  }
  0x30   :  { %614 = vmatmul.mubr.msk.bf16.vlgmr.msra.gmra.mrb[0].mxu0 %vm121_vm0, %v50_v9  ;;  %615 = vmatmul.mubr.msk.bf16.vlgmr.msra.gmra.mrb[0].mxu1 %vm121_vm0, %v50_v9  ;;  %v728_v25 = vld [vmem:[#allocation4 + $0x98] sm:$0xff]   ;;  %v731_v28 = vld [vmem:[#allocation4 + $0x20] sm:$0xff]   ;;  %v735_v32 = vld [vmem:[#allocation4 + $0x28] sm:$0xff]  }
  0x31   :  { %650 = vmatpush3.bf16.msra.mxu0 %v715_v12  ;;  %672 = vmatpush3.bf16.msra.mxu1 %v716_v13  ;;  %v732_v29 = vld [vmem:[#allocation4 + $0xa0] sm:$0xff]   ;;  %v736_v33 = vld [vmem:[#allocation4 + $0xa8] sm:$0xff]   ;;  %v737_v34 = vld [vmem:[#allocation4 + $0x70] sm:$0xff]  }
  0x32   :  { %651 = vmatprep.subr.bf16.mxu0 %v717_v14  ;;  %673 = vmatprep.subr.bf16.mxu1 %v718_v15  ;;  %v738_v35 = vld [vmem:[#allocation4 + $0xf0] sm:$0xff]   ;;  %v741_v38 = vld [vmem:[#allocation4 + $0x78] sm:$0xff]   ;;  %v59_v46 = vld [vmem:[%s891_s2] sm:$0xf] }
  0x33   :  { %v739_v36 = vld [vmem:[#allocation4 + $0x30] sm:$0xff]   ;;  %v742_v39 = vld [vmem:[#allocation4 + $0xf8] sm:$0xff]   ;;  %v64_v49 = vrot.slane %v59_v46, %v63_v44  ;;  %v72_v50 = vrot.slane %v59_v46, %v71_v45  ;;  %v68_v51 = vrot.slane %v59_v46, %v67_v47  ;;  %v76_v52 = vrot.slane %v59_v46, %v75_v48 }
  0x34   :  { %v740_v37 = vld [vmem:[#allocation4 + $0xb0] sm:$0xff]   ;;  %v743_v40 = vld [vmem:[#allocation4 + $0x38] sm:$0xff]  }
  0x35   :  { %652 = vmatpush3.bf16.msra.mxu0 %v719_v16  ;;  %674 = vmatpush3.bf16.msra.mxu1 %v720_v17  ;;  %v744_v41 = vld [vmem:[#allocation4 + $0xb8] sm:$0xff]   ;;  %v812_v17 = vmov 1065369472  }
  0x36   :  { %653 = vmatprep.subr.bf16.mxu0 %v721_v18  ;;  %675 = vmatprep.subr.bf16.mxu1 %v722_v19 }
  0x39   :  { %654 = vmatpush3.bf16.msra.mxu0 %v723_v20  ;;  %676 = vmatpush3.bf16.msra.mxu1 %v724_v21 }
  0x3a   :  { %655 = vmatprep.subr.bf16.mxu0 %v725_v22  ;;  %677 = vmatprep.subr.bf16.mxu1 %v726_v23 }
  0x3d   :  { %656 = vmatpush3.bf16.msra.mxu0 %v727_v24  ;;  %678 = vmatpush3.bf16.msra.mxu1 %v728_v25 }
  0x3e   :  { %657 = vmatprep.subr.bf16.mxu0 %v729_v26  ;;  %679 = vmatprep.subr.bf16.mxu1 %v730_v27 }
  0x41   :  { %658 = vmatpush3.bf16.msra.mxu0 %v731_v28  ;;  %680 = vmatpush3.bf16.msra.mxu1 %v732_v29  ;;  %v616_v28 = vld [vmem:[%s893_s4] ss:$0 sm:$0xff] }
  0x42   :  { %659 = vmatprep.subr.bf16.mxu0 %v733_v30  ;;  %681 = vmatprep.subr.bf16.mxu1 %v734_v31  ;;  %v583_v30 = vand.u32 127, %v61_v42 }
  0x44   :  { %vm584_vm5 = vcmp.lt.s32.totalorder %v583_v30, 4  ;;  %vm596_vm6 = vcmp.eq.s32.totalorder %v583_v30, 4 }
  0x45   :  { %660 = vmatpush3.bf16.msra.mxu0 %v735_v32  ;;  %682 = vmatpush3.bf16.msra.mxu1 %v736_v33 }
  0x46   :  { %661 = vmatprep.subr.bf16.mxu0 %v737_v34  ;;  %683 = vmatprep.subr.bf16.mxu1 %v738_v35 }
  0x49   :  { %662 = vmatpush3.bf16.msra.mxu0 %v739_v36  ;;  %684 = vmatpush3.bf16.msra.mxu1 %v740_v37 }
  0x4a   :  { %663 = vmatprep.subr.bf16.mxu0 %v741_v38  ;;  %685 = vmatprep.subr.bf16.mxu1 %v742_v39 }
  0x4d   :  { %664 = vmatpush3.bf16.msra.mxu0 %v743_v40  ;;  %686 = vmatpush3.bf16.msra.mxu1 %v744_v41 }
 0x103   :  { %v159_v53 = vpop.f32.mrb[0].mxu0  ;;  %v200_v54 = vpop.f32.mrb[0].mxu1 }
 0x104   :  { %v160_v55 = vadd.f32 %v159_v53, %v64_v49  ;;  %v201_v56 = vadd.f32 %v200_v54, %v72_v50  ;;  %v161_v57 = vpop.f32.mrb[1].mxu0  ;;  %v202_v58 = vpop.f32.mrb[1].mxu1 }
 0x105   :  { %v162_v59 = vadd.f32 %v161_v57, %v68_v51  ;;  %v203_v60 = vadd.f32 %v202_v58, %v76_v52  ;;  %v163_v61 = vpop.f32.mrb[2].mxu0  ;;  %v204_v62 = vpop.f32.mrb[2].mxu1 }
 0x106   :  { %v207_v63 = vpack.c.bf16 %v160_v55, %v160_v55  ;;  %v209_v1 = vpack.c.bf16 %v201_v56, %v201_v56  ;;  %v164_v2 = vpop.f32.mrb[3].mxu0  ;;  %v205_v3 = vpop.f32.mrb[3].mxu1 }
 0x107   :  { %v208_v4 = vpack.c.bf16 %v162_v59, %v162_v59  ;;  %v210_v5 = vpack.c.bf16 %v203_v60, %v203_v60 }
 0x108   :  { %v215_v6 = vmin.bf16 %v811_v0, %v207_v63  ;;  %v217_v7 = vmin.bf16 %v811_v0, %v209_v1  ;;  %vm211_vm2 = vcmp.gt.bf16.partialorder %v207_v63, 0  ;;  %vm213_vm4 = vcmp.gt.bf16.partialorder %v209_v1, 0 }
 0x109   :  { %v216_v8 = vmin.bf16 %v811_v0, %v208_v4  ;;  %v218_v9 = vmin.bf16 %v811_v0, %v210_v5  ;;  %vm212_vm1 = vcmp.gt.bf16.partialorder %v208_v4, 0  ;;  %vm214_vm3 = vcmp.gt.bf16.partialorder %v210_v5, 0 }
 0x10a   :  { %v220_v10 = vmul.bf16 1069105081, %v215_v6  ;;  %v226_v11 = vmul.bf16 1069105081, %v217_v7 }
 0x10b   :  { %v223_v12 = vmul.bf16 1069105081, %v216_v8  ;;  %v229_v13 = vmul.bf16 1069105081, %v218_v9 }
 0x10c   :  { %745 = vpow.bf16 %v220_v10 }
 0x10d   :  { %747 = vpow.bf16 %v226_v11 }
 0x10e   :  { %749 = vpow.bf16 %v223_v12 }
 0x10f   :  { %751 = vpow.bf16 %v229_v13 }
 0x117   :  { %v746_v14 = vpop.eup %745 }
 0x118   :  { %v748_v15 = vpop.eup %747  ;;  %v231_v18 = vsub.bf16 %v746_v14, %v812_v17 }
 0x119   :  { %v750_v16 = vpop.eup %749  ;;  %v233_v21 = vsub.bf16 %v748_v15, %v812_v17 }
 0x11a   :  { %v752_v19 = vpop.eup %751  ;;  %v232_v20 = vsub.bf16 %v750_v16, %v812_v17  ;;  %v235_v24 = vsel %vm211_vm2, %v207_v63, %v231_v18 }
 0x11b   :  { %v234_v22 = vsub.bf16 %v752_v19, %v812_v17  ;;  %v237_v25 = vsel %vm213_vm4, %v209_v1, %v233_v21 }
 0x11c   :  { %v236_v0 = vsel %vm212_vm1, %v208_v4, %v232_v20 }
 0x11d   :  { %534 = vmatprep.mubr.bf16.mxu0 %v236_v0  ;;  %v238_v23 = vsel %vm214_vm3, %v210_v5, %v234_v22 }
 0x11e   :  { %574 = vmatprep.mubr.bf16.mxu1 %v238_v23  ;;  %535 = vmatmul.mubr.bf16.vlgmr.msra.gmra.mrb[4].mxu0 %v235_v24 }
 0x11f   :  { %575 = vmatmul.mubr.bf16.vlgmr.msra.gmra.mrb[4].mxu1 %v237_v25 }
 0x1f1   :  { %v665_v26 = vpop.f32.mrb[4].mxu0 }
 0x1f2   :  { %v687_v27 = vpop.f32.mrb[4].mxu1  ;;  %v666_v29 = vpop.f32.mrb[5].mxu0 }
 0x1f3   :  { %v667_v31 = vadd.f32 %v666_v29, %v665_v26  ;;  %v688_v32 = vpop.f32.mrb[5].mxu1  ;;  %v668_v33 = vpop.f32.mrb[6].mxu0 }
 0x1f4   :  { %v689_v34 = vadd.f32 %v688_v32, %v687_v27  ;;  %v690_v35 = vpop.f32.mrb[6].mxu1  ;;  %v669_v36 = vpop.f32.mrb[7].mxu0 }
 0x1f5   :  { %v537_v37 = vadd.f32 %v667_v31, %v616_v28  ;;  %v691_v38 = vpop.f32.mrb[7].mxu1 }
 0x1f7   :  { %v577_v39 = vadd.f32 %v689_v34, %v537_v37 }
 0x1f9   :  { %v585_v40 = vsel %vm584_vm5, %v577_v39, -1e+30  ;;  %v597_v41 = vsel %vm596_vm6, %v577_v39, 0.0 }
 0x1fa   :  { %586 = vmax.xlane.f32.xlu0 %v585_v40 }
 0x287   :  { %v587_v43 = vpop.xlane.xlu0 %586 }
 0x288   :  { %v588_v44 = vsub.f32 %v585_v40, %v587_v43 }
 0x28a   :  { %v589_v45 = vmul.f32 1.442695, %v588_v44 }
 0x28c   :  { %753 = vpow2.f32 %v589_v45 }
 0x296   :  { %v754_v42 = vpop.eup %753 }
 0x297   :  { %591 = vadd.xlane.f32.xlu0 %v754_v42 }
 0x324   :  { %v592_v46 = vpop.xlane.xlu0 %591 }
 0x325   :  { %755 = vrcp.f32 %v592_v46 }
 0x32f   :  { %v756_v47 = vpop.eup %755 }
 0x330   :  { %v594_v48 = vmul.f32 %v756_v47, %v754_v42 }
 0x332   :  { %v595_v49 = vsel %vm584_vm5, %v594_v48, 0.0 }
 0x333   :  { %v598_v50 = vadd.f32 %v597_v41, %v595_v49 }
 0x335   :  { %599 = vst [vmem:[%s894_s5] sm:$0xff] %v598_v50 }
 0x336   :  { %604 = vsyncpa [#allocation3], 1 }
 0x337   :  { %605 = vsyncpa [#allocation5], 1 }

</bundles_post_ra>
